<compile_context>
chip_gen: v6e
topology: v6e:2x2x1
jax: 0.10.0
libtpu: 0.0.40
codegen_flags: <defaults>
</compile_context>

<pallas_src>
import math

import jax
import jax.numpy as jnp
from jax.experimental import pallas as pl
from jax.experimental.pallas import tpu as pltpu


# ------------------------------ Pallas kernels -------------------------------

def _tt_linear_bias_kernel(x_ref, w_ref, b_ref, o_ref, acc_ref):
    """One (tm, tn) output tile of y = x @ W + b, accumulated over the K axis.

    x_ref: (tm, tk)    activation tile
    w_ref: (tk, tn)    dense TT weight tile (out_features on the lane axis)
    b_ref: (1, tn)     bias tile (f32)
    o_ref: (tm, tn)    output tile
    acc_ref: (tm, tn)  f32 accumulator scratch (persists across the K grid axis)
    """
    k = pl.program_id(2)

    @pl.when(k == 0)
    def _init():
        acc_ref[...] = jnp.zeros_like(acc_ref)

    acc_ref[...] += jnp.dot(x_ref[...], w_ref[...],
                            preferred_element_type=jnp.float32)

    @pl.when(k == pl.num_programs(2) - 1)
    def _finalize():
        o_ref[...] = (acc_ref[...] + b_ref[...]).astype(o_ref.dtype)


def _tt_linear_nobias_kernel(x_ref, w_ref, o_ref, acc_ref):
    """Same as above without the bias operand (no zeros-bias HBM traffic)."""
    k = pl.program_id(2)

    @pl.when(k == 0)
    def _init():
        acc_ref[...] = jnp.zeros_like(acc_ref)

    acc_ref[...] += jnp.dot(x_ref[...], w_ref[...],
                            preferred_element_type=jnp.float32)

    @pl.when(k == pl.num_programs(2) - 1)
    def _finalize():
        o_ref[...] = acc_ref[...].astype(o_ref.dtype)


# ------------------------- TT weight reconstruction --------------------------

def tt_dense_weight(tt_cores, raw_shape, dtype=jnp.bfloat16):
    """Dense (in_features, out_features) matrix of the TT-matrix, in `dtype`.

    tt_cores[k] has shape (r_k, in_modes[k], out_modes[k], r_{k+1}).
    The core chain is a handful of micro-matmuls (far below one MXU tile), so
    it is contracted in plain f32 jnp (XLA fuses it); only the final full-size
    result is emitted in the compute dtype so the wrapper never writes an extra
    f32 copy of W to HBM.
    """
    in_modes, out_modes = raw_shape
    d = len(tt_cores)
    ranks = [c.shape[0] for c in tt_cores] + [tt_cores[-1].shape[-1]]
    assert ranks[0] == 1 and ranks[-1] == 1, "boundary TT ranks must be 1"

    res = tt_cores[0].astype(jnp.float32).reshape(
        in_modes[0] * out_modes[0], ranks[1])
    for k in range(1, d):
        core = tt_cores[k].astype(jnp.float32).reshape(ranks[k], -1)
        res = res.reshape(-1, ranks[k]) @ core

    res = res.astype(dtype)                         # cast BEFORE the big reshape
    inter = []
    for k in range(d):
        inter += [in_modes[k], out_modes[k]]
    res = res.reshape(inter)
    perm = list(range(0, 2 * d, 2)) + list(range(1, 2 * d, 2))
    res = jnp.transpose(res, perm)
    return res.reshape(int(math.prod(in_modes)), int(math.prod(out_modes)))


# ------------------------------ Tiling helpers --------------------------------

_VMEM_BUDGET_BYTES = 24 * 1024 * 1024   # safe on v7x (64 MiB VMEM, 32 MiB scoped)


def _round_up(x, m):
    return ((x + m - 1) // m) * m


def _vmem_bytes(tm, tn, tk, in_bytes, out_bytes, has_bias):
    b = 2 * (tm * tk + tk * tn) * in_bytes   # double-buffered x / w tiles
    b += 2 * tm * tn * out_bytes             # double-buffered output tile
    b += tm * tn * 4                         # f32 accumulator scratch
    if has_bias:
        b += 2 * 1 * tn * 4
    return b


def _choose_tiles(batch, in_features, out_features, in_bytes, out_bytes,
                  has_bias, block_m, block_n, block_k):
    """Pick (tm, tn, tk) and padded dims (Mp, Kp, Np).

    All tiles are (8,128)-legal, lane-dense on N, and the double-buffered
    resident set stays under the per-generation-safe VMEM budget.
    """
    tn = min(block_n, _round_up(out_features, 128))   # multiple of 128
    tk = min(block_k, _round_up(in_features, 128))    # multiple of 128
    tm = min(block_m, _round_up(batch, 8))            # multiple of 8

    # Shrink until within the VMEM budget (prefer K, then M, then N).
    while _vmem_bytes(tm, tn, tk, in_bytes, out_bytes, has_bias) > _VMEM_BUDGET_BYTES:
        if tk % 256 == 0:
            tk //= 2
        elif tm % 16 == 0:
            tm //= 2
        elif tn % 256 == 0:
            tn //= 2
        else:
            break

    Mp = _round_up(batch, tm)
    Kp = _round_up(in_features, tk)
    Np = _round_up(out_features, tn)

    # v7x megacore: if M has a single block, make sure N has >= 2 parallel
    # blocks so both TensorCores get work (no-op on v5e/v6e).
    if Mp // tm == 1:
        while Np // tn < 2 and tn % 256 == 0:
            tn //= 2

    return tm, tn, tk, Mp, Kp, Np


# ------------------------------ Forward wrapper -------------------------------

def tt_linear_forward(x, tt_cores, raw_shape, bias=None, *,
                      compute_dtype=jnp.bfloat16,
                      block_m=256, block_n=256, block_k=512):
    """y = x @ dense(TT-matrix) + bias   (masks=None path of TTLinear.forward).

    compute_dtype: dtype fed to the MXU (default bf16 for full-rate MXU on all
    generations); accumulation is always f32; output dtype is x.dtype.
    """
    assert x.ndim == 2, "expected (batch, in_features)"
    batch, in_features = x.shape
    out_dtype = x.dtype

    cdt = jnp.dtype(compute_dtype)
    # Dense TT weight reconstructed directly in the compute dtype.
    w = tt_dense_weight(tt_cores, raw_shape, dtype=cdt)  # (in_f, out_f)
    out_features = w.shape[1]
    assert w.shape[0] == in_features, (w.shape, in_features)

    has_bias = bias is not None
    in_bytes = cdt.itemsize
    out_bytes = jnp.dtype(out_dtype).itemsize

    tm, tn, tk, Mp, Kp, Np = _choose_tiles(
        batch, in_features, out_features, in_bytes, out_bytes, has_bias,
        block_m, block_n, block_k)

    # Zero-pad operands to the padded (tile-aligned) dims; padded K contributes
    # zero to the contraction, padded M/N rows/cols are sliced off at the end.
    x_c = x.astype(cdt)
    if (Mp, Kp) != (batch, in_features):
        x_c = jnp.pad(x_c, ((0, Mp - batch), (0, Kp - in_features)))
    w_c = w
    if (Kp, Np) != (in_features, out_features):
        w_c = jnp.pad(w_c, ((0, Kp - in_features), (0, Np - out_features)))

    grid = (Mp // tm, Np // tn, Kp // tk)

    flops = 2 * Mp * Kp * Np
    bytes_accessed = ((Np // tn) * Mp * Kp * in_bytes      # x re-streamed per N block
                      + (Mp // tm) * Kp * Np * in_bytes    # w re-streamed per M block
                      + Mp * Np * out_bytes)
    if has_bias:
        bytes_accessed += (Mp // tm) * Np * 4
    cost = pl.CostEstimate(flops=flops, transcendentals=0,
                           bytes_accessed=bytes_accessed)

    x_spec = pl.BlockSpec((tm, tk), lambda i, j, k: (i, k))
    w_spec = pl.BlockSpec((tk, tn), lambda i, j, k: (k, j))
    out_spec = pl.BlockSpec((tm, tn), lambda i, j, k: (i, j))
    scratch = [pltpu.VMEM((tm, tn), jnp.float32)]
    cparams = pltpu.CompilerParams(
        dimension_semantics=("parallel", "parallel", "arbitrary"))

    if has_bias:
        b2d = bias.reshape(1, out_features).astype(jnp.float32)
        if Np != out_features:
            b2d = jnp.pad(b2d, ((0, 0), (0, Np - out_features)))
        b_spec = pl.BlockSpec((1, tn), lambda i, j, k: (0, j))
        out_p = pl.pallas_call(
            _tt_linear_bias_kernel,
            out_shape=jax.ShapeDtypeStruct((Mp, Np), out_dtype),
            grid_spec=pltpu.PrefetchScalarGridSpec(
                num_scalar_prefetch=0,
                grid=grid,
                in_specs=[x_spec, w_spec, b_spec],
                out_specs=out_spec,
                scratch_shapes=scratch,
            ),
            compiler_params=cparams,
            cost_estimate=cost,
        )(x_c, w_c, b2d)
    else:
        out_p = pl.pallas_call(
            _tt_linear_nobias_kernel,
            out_shape=jax.ShapeDtypeStruct((Mp, Np), out_dtype),
            grid_spec=pltpu.PrefetchScalarGridSpec(
                num_scalar_prefetch=0,
                grid=grid,
                in_specs=[x_spec, w_spec],
                out_specs=out_spec,
                scratch_shapes=scratch,
            ),
            compiler_params=cparams,
            cost_estimate=cost,
        )(x_c, w_c)

    if (Mp, Np) != (batch, out_features):
        out_p = out_p[:batch, :out_features]
    return out_p


# ---------------------------------- Reference ----------------------------------

def _reference_forward(x, tt_cores, raw_shape, bias):
    """Plain-JAX replica of masked_dense_tt_matmul(x, tt_weight, None) + bias."""
    in_modes, _ = raw_shape
    data = x.reshape([x.shape[0]] + list(in_modes) + [1])
    for core in tt_cores:
        data = jnp.tensordot(data, core, axes=((1, data.ndim - 1), (1, 0)))
    res = data.reshape(x.shape[0], -1)
    if bias is not None:
        res = res + bias
    return res


# ------------------------------------ Demo -------------------------------------

if __name__ == "__main__":
    # Module config (small, consistent with TTLinear defaults: d=3, tt_rank=8)
    batch, in_features, out_features = 8, 32, 32
    d, tt_rank = 3, 8
    # auto_shape(32, d=3, ascending) -> [2, 4, 4]
    raw_shape = ([2, 4, 4], [2, 4, 4])        # [in_quantization, out_quantization]
    ranks = [1, tt_rank, tt_rank, 1]

    key = jax.random.PRNGKey(0)
    kx, kb, *kc = jax.random.split(key, 2 + d)

    # Glorot-like deterministic TT-core init: core k has shape
    # (r_k, in_modes[k], out_modes[k], r_{k+1}); per-core std chosen so the
    # reconstructed dense W has ~glorot variance 2/(in+out).
    lamb = 2.0 / (in_features + out_features)
    r_prod = math.prod(ranks[1:-1])
    core_std = (lamb / r_prod) ** (1.0 / (2.0 * d))
    tt_cores = []
    for i in range(d):
        shp = (ranks[i], raw_shape[0][i], raw_shape[1][i], ranks[i + 1])
        tt_cores.append(core_std * jax.random.normal(kc[i], shp, jnp.float32))

    # bias = 0.001 * randn(out_features), as in the module
    bias = 0.001 * jax.random.normal(kb, (out_features,), jnp.float32)

    # Input: (batch, in_features)
    x = jax.random.normal(kx, (batch, in_features), jnp.float32)

    ref = _reference_forward(x, tt_cores, raw_shape, bias)

    # f32-operand path (exact comparison against the tensordot-chain reference)
    out_f32 = tt_linear_forward(x, tt_cores, raw_shape, bias,
                                compute_dtype=jnp.float32)
    out_f32 = jax.block_until_ready(out_f32)
    assert out_f32.shape == (batch, out_features), out_f32.shape
    assert jnp.allclose(out_f32, ref, atol=1e-4, rtol=1e-4), float(
        jnp.max(jnp.abs(out_f32 - ref)))

    # Default path: bf16 MXU operands, f32 accumulation (looser tolerance).
    out = tt_linear_forward(x, tt_cores, raw_shape, bias)
    out = jax.block_until_ready(out)
    assert out.shape == (batch, out_features), out.shape
    assert jnp.allclose(out.astype(jnp.float32), ref,
                        atol=5e-2, rtol=5e-2), float(
        jnp.max(jnp.abs(out.astype(jnp.float32) - ref)))

    # No-bias path (exercises the bias-free kernel).
    out_nb = tt_linear_forward(x, tt_cores, raw_shape, None,
                               compute_dtype=jnp.float32)
    out_nb = jax.block_until_ready(out_nb)
    ref_nb = _reference_forward(x, tt_cores, raw_shape, None)
    assert jnp.allclose(out_nb, ref_nb, atol=1e-4, rtol=1e-4), float(
        jnp.max(jnp.abs(out_nb - ref_nb)))

    print("KERNEL_OK")
</pallas_src>

<mosaic_0001>
module attributes {stable_mosaic.version = 11 : i64} {
  func.func @_tt_linear_bias_kernel(%arg0: i32, %arg1: i32, %arg2: i32, %arg3: memref<8x128xf32, #tpu.memory_space<vmem>>, %arg4: memref<128x128xf32, #tpu.memory_space<vmem>>, %arg5: memref<1x128xf32, #tpu.memory_space<vmem>>, %arg6: memref<8x128xf32, #tpu.memory_space<vmem>>, %arg7: memref<8x128xf32, #tpu.memory_space<vmem>>) attributes {dimension_semantics = [#tpu.dimension_semantics<parallel>, #tpu.dimension_semantics<parallel>, #tpu.dimension_semantics<arbitrary>], iteration_bounds = array<i64: 1, 1, 1>, scalar_prefetch = 0 : i64, scratch_operands = 1 : i64, tpu.core_type = #tpu.core_type<tc>, window_params = [{transform_indices = @transform_0, window_bounds = array<i64: 8, 128>}, {transform_indices = @transform_1, window_bounds = array<i64: 128, 128>}, {transform_indices = @transform_2, window_bounds = array<i64: 1, 128>}, {transform_indices = @transform_3, window_bounds = array<i64: 8, 128>}]} {
    %c0_i32 = arith.constant 0 : i32
    %0 = arith.cmpi eq, %arg2, %c0_i32 : i32
    %1 = arith.extui %0 : i1 to i32
    %c0_i32_0 = arith.constant 0 : i32
    %2 = arith.cmpi ne, %1, %c0_i32_0 : i32
    scf.if %2 {
      %cst_10 = arith.constant 0.000000e+00 : f32
      %12 = vector.broadcast %cst_10 : f32 to vector<8x128xf32>
      %c0_11 = arith.constant 0 : index
      %c0_12 = arith.constant 0 : index
      %13 = vector.load %arg7[%c0_11, %c0_12] : memref<8x128xf32, #tpu.memory_space<vmem>>, vector<8x128xf32>
      tpu.vector_store %arg7[%c0_11, %c0_12], %12 {strides = array<i32>} : memref<8x128xf32, #tpu.memory_space<vmem>>, vector<8x128xf32>,
    } else {
    }
    %c0 = arith.constant 0 : index
    %c0_1 = arith.constant 0 : index
    %3 = vector.load %arg7[%c0, %c0_1] : memref<8x128xf32, #tpu.memory_space<vmem>>, vector<8x128xf32>
    %c0_2 = arith.constant 0 : index
    %c0_3 = arith.constant 0 : index
    %4 = vector.load %arg3[%c0_2, %c0_3] : memref<8x128xf32, #tpu.memory_space<vmem>>, vector<8x128xf32>
    %c0_4 = arith.constant 0 : index
    %c0_5 = arith.constant 0 : index
    %5 = vector.load %arg4[%c0_4, %c0_5] : memref<128x128xf32, #tpu.memory_space<vmem>>, vector<128x128xf32>
    %cst = arith.constant dense<0.000000e+00> : vector<8x128xf32>
    %6 = tpu.matmul %4, %5, %cst {dimension_numbers = #tpu.dot_dimension_numbers<[1], [0], [0], [1], [0, 0, 1, 1], [], []>} : vector<8x128xf32>, vector<128x128xf32>, vector<8x128xf32> -> vector<8x128xf32>
    %7 = arith.addf %3, %6 : vector<8x128xf32>
    %c0_6 = arith.constant 0 : index
    %c0_7 = arith.constant 0 : index
    %8 = vector.load %arg7[%c0_6, %c0_7] : memref<8x128xf32, #tpu.memory_space<vmem>>, vector<8x128xf32>
    tpu.vector_store %arg7[%c0_6, %c0_7], %7 {strides = array<i32>} : memref<8x128xf32, #tpu.memory_space<vmem>>, vector<8x128xf32>,
    %c0_i32_8 = arith.constant 0 : i32
    %9 = arith.cmpi eq, %arg2, %c0_i32_8 : i32
    %10 = arith.extui %9 : i1 to i32
    %c0_i32_9 = arith.constant 0 : i32
    %11 = arith.cmpi ne, %10, %c0_i32_9 : i32
    scf.if %11 {
      %c0_10 = arith.constant 0 : index
      %c0_11 = arith.constant 0 : index
      %12 = vector.load %arg7[%c0_10, %c0_11] : memref<8x128xf32, #tpu.memory_space<vmem>>, vector<8x128xf32>
      %c0_12 = arith.constant 0 : index
      %c0_13 = arith.constant 0 : index
      %13 = vector.load %arg5[%c0_12, %c0_13] : memref<1x128xf32, #tpu.memory_space<vmem>>, vector<1x128xf32>
      %14 = vector.broadcast %13 : vector<1x128xf32> to vector<8x128xf32>
      %15 = arith.addf %12, %14 : vector<8x128xf32>
      %c0_14 = arith.constant 0 : index
      %c0_15 = arith.constant 0 : index
      %16 = vector.load %arg6[%c0_14, %c0_15] : memref<8x128xf32, #tpu.memory_space<vmem>>, vector<8x128xf32>
      tpu.vector_store %arg6[%c0_14, %c0_15], %15 {strides = array<i32>} : memref<8x128xf32, #tpu.memory_space<vmem>>, vector<8x128xf32>,
    } else {
    }
    return
  }
  func.func @transform_0(%arg0: i32, %arg1: i32, %arg2: i32) -> (i32, i32) {
    %c0_i32 = arith.constant 0 : i32
    return %arg0, %arg2 : i32, i32
  }
  func.func @transform_1(%arg0: i32, %arg1: i32, %arg2: i32) -> (i32, i32) {
    %c0_i32 = arith.constant 0 : i32
    return %arg2, %arg1 : i32, i32
  }
  func.func @transform_2(%arg0: i32, %arg1: i32, %arg2: i32) -> (i32, i32) {
    %c0_i32 = arith.constant 0 : i32
    %c0_i32_0 = arith.constant 0 : i32
    return %c0_i32, %arg1 : i32, i32
  }
  func.func @transform_3(%arg0: i32, %arg1: i32, %arg2: i32) -> (i32, i32) {
    %c0_i32 = arith.constant 0 : i32
    return %arg0, %arg1 : i32, i32
  }
}

</mosaic_0001>

<bundles_post_ra>
// kernel: tpu_custom_call.1
= control target key start
LH: loop header
LB: loop body
LE: loop exit
PB: predicated region body
PF: predicated region fallthrough
CT: control target
= control target key end

     0   :  { %8 = vsyncpa [#allocation4], 0  ;;  %s330_s0 = inlined_call_operand.hbm [shape: f32[8,128], index: 0, kind: input, shape index: {}]   ;;  %s331_s1 = inlined_call_operand.hbm [shape: f32[128,128], index: 1, kind: input, shape index: {}]   ;;  %s332_s2 = inlined_call_operand.vmem [shape: f32[1,128], index: 2, kind: input, shape index: {}]   ;;  %s333_s3 = inlined_call_operand.hbm [shape: f32[8,128], index: 3, kind: output, shape index: {}]  }
   0x1   :  { %9 = vsyncpa [#allocation7], 0 }
   0x2   :  { %10 = vsyncpa [#allocation5], 0  ;;  %s291_s12 = smov [#allocation3]   ;;  %s292_s14 = smov [#allocation6]  }
   0x3   :  { %s17_s13 = sshll.u32 %s291_s12, 4  ;;  %s26_s15 = sshll.u32 %s292_s14, 4  ;;  %s18_s13 = int_to_ptr.vmem [resolvable:$true] %s17_s13  ;;  %s27_s15 = int_to_ptr.vmem [resolvable:$true] %s26_s15 }
   0x4   :  { %s233_s16 = scalar_lea.vmem %s18_s13, 128  ;;  %p238_p1 = scmp.lt.s32.totalorder %s18_s13, %s18_s13 }
   0x5   :  { %p234_p0 = scmp.ne.s32.totalorder %s18_s13, %s233_s16  ;;  %p239_p2 = scmp.lt.s32.totalorder %s233_s16, %s233_s16 }
   0x7   :  { %p240_p3 = por %p239_p2, %p238_p1 }
   0x9   :  { %p241_p4 = pnand %p240_p3, %p234_p0 }
   0xb   :  { %244 = shalt.err (!%p241_p4)
}
   0xc   :  { %20 = dma.hbm_to_vmem [thread:$0]  %s330_s0, 128, %s18_s13, [#allocation4]  }
   0xd   :  { %s253_s19 = scalar_lea.vmem %s27_s15, 2048  ;;  %p258_p6 = scmp.lt.s32.totalorder %s27_s15, %s27_s15 }
   0xe   :  { %p254_p5 = scmp.ne.s32.totalorder %s27_s15, %s253_s19  ;;  %p259_p7 = scmp.lt.s32.totalorder %s253_s19, %s253_s19 }
  0x10   :  { %p260_p8 = por %p259_p7, %p258_p6 }
  0x12   :  { %p261_p9 = pnand %p260_p8, %p254_p5 }
  0x14   :  { %264 = shalt.err (!%p261_p9)
}
  0x15   :  { %s293_s20 = smov 128   ;;  %s294_s21 = smov 8  }
  0x16   :  { %32 = dma.hbm_to_vmem [thread:$0]  %s331_s1, 2048, %s27_s15, [#allocation7], %s293_s20, %s293_s20, %s294_s21  }
  0x17   :  { %285 = dma.done.wait [#allocation4], 128  }
  0x18   :  { %286 = vsyncadd [#allocation4], 4294967168 }
  0x19   :  { %287 = dma.done.wait [#allocation7], 2048  }
  0x1a   :  { %288 = vsyncadd [#allocation7], 4294965248  ;;  %v295_v0 = vmov 0.0   ;;  %vm296_vm0 = vmmov 0   ;;  %v63_v1 = vld [vmem:[#allocation6 + $0x78] sm:$0xff]  ;;  %v62_v2 = vld [vmem:[#allocation6 + $0x70] sm:$0xff] }
  0x1b   :  { %183 = vmatprep.subr.mxu0 %v295_v0  ;;  %215 = vmatprep.mubr.msk.f32.mxu0 %vm296_vm0, %v295_v0  ;;  %v61_v3 = vld [vmem:[#allocation6 + $0x68] sm:$0xff]  ;;  %v60_v4 = vld [vmem:[#allocation6 + $0x60] sm:$0xff]  ;;  %v59_v5 = vld [vmem:[#allocation6 + $0x58] sm:$0xff]  ;;  %s297_s24 = smov [#allocation8]  }
  0x1c   :  { %184 = vmatpush3.msra.mxu0 %v63_v1  ;;  %v58_v6 = vld [vmem:[#allocation6 + $0x50] sm:$0xff]  ;;  %v57_v7 = vld [vmem:[#allocation6 + $0x48] sm:$0xff]  ;;  %v56_v8 = vld [vmem:[#allocation6 + $0x40] sm:$0xff]  ;;  %s155_s25 = sshll.u32 %s297_s24, 4  ;;  %s156_s25 = int_to_ptr.vmem [resolvable:$true] %s155_s25 }
  0x1d   :  { %185 = vmatprep.subr.mxu0 %v295_v0  ;;  %v55_v9 = vld [vmem:[#allocation6 + $0x38] sm:$0xff]  ;;  %v54_v10 = vld [vmem:[#allocation6 + $0x30] sm:$0xff]  ;;  %v53_v11 = vld [vmem:[#allocation6 + $0x28] sm:$0xff]  ;;  %s265_s26 = scalar_lea.vmem %s156_s25, 128  ;;  %p270_p11 = scmp.lt.s32.totalorder %s156_s25, %s156_s25 }
  0x1e   :  { %186 = vmatpush3.msra.mxu0 %v62_v2  ;;  %v52_v12 = vld [vmem:[#allocation6 + $0x20] sm:$0xff]  ;;  %v51_v13 = vld [vmem:[#allocation6 + $0x18] sm:$0xff]  ;;  %v50_v14 = vld [vmem:[#allocation6 + $0x10] sm:$0xff]  ;;  %p266_p10 = scmp.ne.s32.totalorder %s156_s25, %s265_s26  ;;  %p271_p12 = scmp.lt.s32.totalorder %s265_s26, %s265_s26 }
  0x1f   :  { %187 = vmatprep.subr.mxu0 %v295_v0  ;;  %v49_v15 = vld [vmem:[#allocation6 + $0x8] sm:$0xff]  ;;  %v48_v16 = vld [vmem:[#allocation6] sm:$0xff]  ;;  %v47_v17 = vld [vmem:[#allocation3] sm:$0xff] }
  0x20   :  { %188 = vmatpush3.msra.mxu0 %v61_v3  ;;  %v165_v18 = vld [vmem:[%s332_s2] ss:$0 sm:$0xff]  ;;  %p272_p13 = por %p271_p12, %p270_p11 }
  0x21   :  { %189 = vmatprep.subr.mxu0 %v295_v0 }
  0x22   :  { %190 = vmatpush3.msra.mxu0 %v60_v4  ;;  %p273_p0 = pnand %p272_p13, %p266_p10 }
  0x23   :  { %191 = vmatprep.subr.mxu0 %v295_v0 }
  0x24   :  { %192 = vmatpush3.msra.mxu0 %v59_v5 }
  0x25   :  { %193 = vmatprep.subr.mxu0 %v295_v0 }
  0x26   :  { %194 = vmatpush3.msra.mxu0 %v58_v6 }
  0x27   :  { %195 = vmatprep.subr.mxu0 %v295_v0 }
  0x28   :  { %196 = vmatpush3.msra.mxu0 %v57_v7 }
  0x29   :  { %197 = vmatprep.subr.mxu0 %v295_v0 }
  0x2a   :  { %198 = vmatpush3.msra.mxu0 %v56_v8 }
  0x2b   :  { %199 = vmatprep.subr.mxu0 %v295_v0 }
  0x2c   :  { %200 = vmatpush3.msra.mxu0 %v55_v9 }
  0x2d   :  { %201 = vmatprep.subr.mxu0 %v295_v0 }
  0x2e   :  { %202 = vmatpush3.msra.mxu0 %v54_v10 }
  0x2f   :  { %203 = vmatprep.subr.mxu0 %v295_v0 }
  0x30   :  { %204 = vmatpush3.msra.mxu0 %v53_v11 }
  0x31   :  { %205 = vmatprep.subr.mxu0 %v295_v0 }
  0x32   :  { %206 = vmatpush3.msra.mxu0 %v52_v12 }
  0x33   :  { %207 = vmatprep.subr.mxu0 %v295_v0 }
  0x34   :  { %208 = vmatpush3.msra.mxu0 %v51_v13 }
  0x35   :  { %209 = vmatprep.subr.mxu0 %v295_v0 }
  0x36   :  { %210 = vmatpush3.msra.mxu0 %v50_v14 }
  0x37   :  { %211 = vmatprep.subr.mxu0 %v295_v0 }
  0x38   :  { %212 = vmatpush3.msra.mxu0 %v49_v15 }
  0x39   :  { %213 = vmatprep.subr.mxu0 %v295_v0 }
  0x3a   :  { %214 = vmatpush3.msra.mxu0 %v48_v16 }
  0x3b   :  { %216 = vmatmul.mubr.f32.vlgmr.msra.gmra.mxu0 %v47_v17 }
  0xfb   :  { %v130_v19 = vpop.f32.mrf.mxu0 }
  0xfc   :  { %v147_v20 = vadd.f32 %v165_v18, %v130_v19 }
  0xfd   :  { %v217_v21 = vpop.f32.mrf.mxu0 }
  0xfe   :  { %148 = vst [vmem:[#allocation8] sm:$0xff] %v147_v20 }
  0xff   :  { %276 = shalt.err (!%p273_p0)
}
 0x100   :  { %158 = dma.vmem_to_hbm [thread:$0]  %s156_s25, 128, %s333_s3, [#allocation5]  }
 0x101   :  { %289 = dma.done.wait [#allocation5], 128  }
 0x102   :  { %290 = vsyncadd [#allocation5], 4294967168 }
 0x103   :  { %162 = vsyncpa [#allocation4], 1 }
 0x104   :  { %163 = vsyncpa [#allocation7], 1 }
 0x105   :  { %164 = vsyncpa [#allocation5], 1 }

</bundles_post_ra>
